<compile_context>
chip_gen: v7x
topology: tpu7x:2x2x1
jax: 0.10.0
libtpu: 0.0.40
codegen_flags: <defaults>
</compile_context>

<pallas_src>
import functools

import jax
import jax.numpy as jnp
from jax.experimental import pallas as pl
from jax.experimental.pallas import tpu as pltpu


def _fused_gnn_kernel(x_ref, adj_ref, *refs, layer_meta, out_pad):
    """Fully fused multi-layer GNN forward; everything resident in VMEM.

    layer_meta: tuple of (mode, d_out, apply_relu) per layer.
      mode "A": weight is (2*D_in, D_out); h = concat([x, adj@x]) @ W
      mode "B": weight is (D_in, 2*D_out); xw = x @ W; h = xw[:, :d] + adj @ xw[:, d:]
    """
    w_refs = refs[:-1]
    o_ref = refs[-1]

    adj = adj_ref[...]                      # (N, N) bf16, reused by every layer
    h = x_ref[...]                          # (N, D0) bf16
    out_f32 = None

    for w_ref, (mode, d_out, apply_relu) in zip(w_refs, layer_meta):
        w = w_ref[...]
        if mode == "A":
            # D_in <= D_out: contract adj against D_in, then one stacked matmul.
            agg = jnp.dot(adj, h, preferred_element_type=jnp.float32)      # (N, D_in)
            xa = jnp.concatenate([h, agg.astype(jnp.bfloat16)], axis=-1)   # (N, 2*D_in)
            hn = jnp.dot(xa, w, preferred_element_type=jnp.float32)        # (N, D_out)
        else:
            # D_out < D_in: stacked matmul first, then contract adj against D_out.
            xw = jnp.dot(h, w, preferred_element_type=jnp.float32)         # (N, 2*D_out)
            h_neigh = jnp.dot(adj, xw[:, d_out:].astype(jnp.bfloat16),
                              preferred_element_type=jnp.float32)          # (N, D_out)
            hn = xw[:, :d_out] + h_neigh
        if apply_relu:
            hn = jnp.maximum(hn, 0.0)
        out_f32 = hn                          # keep f32 for the final write
        h = hn.astype(jnp.bfloat16)           # bf16 activation feeds the next layer

    n, d_last = out_f32.shape
    if d_last < out_pad:                      # lane-dense (unmasked) store
        out_f32 = jnp.concatenate(
            [out_f32, jnp.zeros((n, out_pad - d_last), jnp.float32)], axis=-1)
    o_ref[...] = out_f32.astype(o_ref.dtype)


def init_gnn_params(key, input_dim, hidden_dim, output_dim, num_layers=2):
    """Deterministic init matching GNNModule's layer shapes.

    Each layer is (w_self, w_neigh), stored as (D_in, D_out) == nn.Linear.weight.T.
    """
    dims = [(input_dim, hidden_dim)] + [(hidden_dim, hidden_dim)] * (num_layers - 1)
    dims.append((hidden_dim, output_dim))  # out_layer
    params = []
    for (d_in, d_out) in dims:
        key, k1, k2 = jax.random.split(key, 3)
        scale = 1.0 / jnp.sqrt(jnp.float32(d_in))
        w_self = jax.random.uniform(k1, (d_in, d_out), jnp.float32, -scale, scale)
        w_neigh = jax.random.uniform(k2, (d_in, d_out), jnp.float32, -scale, scale)
        params.append((w_self, w_neigh))
    return params


def prepare_params(params):
    """Stack (w_self, w_neigh) per layer and pick the adj-contraction order."""
    stacked, meta = [], []
    n_layers = len(params)
    for idx, (w_self, w_neigh) in enumerate(params):
        d_in, d_out = w_self.shape
        apply_relu = idx < n_layers - 1
        if d_out < d_in:
            w = jnp.concatenate([w_self, w_neigh], axis=1)   # (D_in, 2*D_out), mode B
            meta.append(("B", d_out, apply_relu))
        else:
            w = jnp.concatenate([w_self, w_neigh], axis=0)   # (2*D_in, D_out), mode A
            meta.append(("A", d_out, apply_relu))
        stacked.append(w.astype(jnp.bfloat16))
    return tuple(stacked), tuple(meta)


@functools.partial(jax.jit, static_argnames=("layer_meta",))
def gnn_module_forward(x, adj, stacked_ws, layer_meta):
    """GNNModule.forward: all layers fused into a single pallas_call."""
    n = x.shape[0]
    d_out_final = layer_meta[-1][1]
    out_pad = max(128, -(-d_out_final // 128) * 128)

    x_bf = x.astype(jnp.bfloat16)
    adj_bf = adj.astype(jnp.bfloat16)

    # Advisory cost estimate for the XLA scheduler.
    flops = 0
    for w, (mode, d_out, _) in zip(stacked_ws, layer_meta):
        d_in = w.shape[0] // 2 if mode == "A" else w.shape[0]
        flops += 2 * n * n * min(d_in, d_out) + 4 * n * d_in * d_out
    in_bytes = 2 * (x_bf.size + adj_bf.size + sum(w.size for w in stacked_ws))
    out_bytes = 4 * n * out_pad
    cost = pl.CostEstimate(flops=int(flops), transcendentals=0,
                           bytes_accessed=int(in_bytes + out_bytes))

    # Generous VMEM budget: double-buffered I/O + a few activation-sized temps.
    max_width = max(out_pad, max(w.shape[0] + w.shape[1] for w in stacked_ws))
    vmem_bytes = 2 * (in_bytes + out_bytes) + 8 * n * max_width * 4
    vmem_bytes = int(min(max(vmem_bytes, 4 * 1024 * 1024), 100 * 1024 * 1024))

    kernel = functools.partial(_fused_gnn_kernel,
                               layer_meta=layer_meta, out_pad=out_pad)

    in_specs = ([pl.BlockSpec(x_bf.shape, lambda: (0, 0)),
                 pl.BlockSpec(adj_bf.shape, lambda: (0, 0))]
                + [pl.BlockSpec(w.shape, lambda: (0, 0)) for w in stacked_ws])

    out = pl.pallas_call(
        kernel,
        out_shape=jax.ShapeDtypeStruct((n, out_pad), jnp.float32),
        in_specs=in_specs,
        out_specs=pl.BlockSpec((n, out_pad), lambda: (0, 0)),
        compiler_params=pltpu.CompilerParams(vmem_limit_bytes=vmem_bytes),
        cost_estimate=cost,
    )(x_bf, adj_bf, *stacked_ws)

    return out[:, :d_out_final]


def _reference_forward(x, adj, params):
    # Pure-JAX f32 reference matching the PyTorch module exactly.
    for (w_self, w_neigh) in params[:-1]:
        x = jnp.maximum(x @ w_self + (adj @ x) @ w_neigh, 0.0)
    w_self, w_neigh = params[-1]
    return x @ w_self + (adj @ x) @ w_neigh


if __name__ == "__main__":
    # Small shapes consistent with the module: N nodes, feature dims.
    N, INPUT_DIM, HIDDEN_DIM, OUTPUT_DIM, NUM_LAYERS = 64, 16, 32, 8, 2

    key = jax.random.PRNGKey(0)
    key, kx, ka = jax.random.split(key, 3)
    x = jax.random.normal(kx, (N, INPUT_DIM), jnp.float32)
    # Symmetric {0,1} adjacency with self-loops (typical Cora-style input).
    a = (jax.random.uniform(ka, (N, N)) < 0.1).astype(jnp.float32)
    adj = jnp.maximum(a, a.T)
    adj = jnp.maximum(adj, jnp.eye(N, dtype=jnp.float32))

    params = init_gnn_params(key, INPUT_DIM, HIDDEN_DIM, OUTPUT_DIM, NUM_LAYERS)
    stacked_ws, layer_meta = prepare_params(params)

    out = gnn_module_forward(x, adj, stacked_ws, layer_meta=layer_meta)
    out = jax.block_until_ready(out)

    ref = _reference_forward(x, adj, params)
    assert out.shape == (N, OUTPUT_DIM)
    # bf16 inputs / f32 accumulation -> relaxed tolerance vs. the f32 reference.
    max_err = float(jnp.max(jnp.abs(out - ref)))
    assert jnp.allclose(out, ref, atol=2e-1, rtol=2e-2), max_err

    print("KERNEL_OK")
</pallas_src>

<mosaic_0001>
module attributes {stable_mosaic.version = 11 : i64} {
  func.func @_fused_gnn_kernel(%arg0: memref<64x16xbf16, #tpu.memory_space<vmem>>, %arg1: memref<64x64xbf16, #tpu.memory_space<vmem>>, %arg2: memref<32x32xbf16, #tpu.memory_space<vmem>>, %arg3: memref<64x32xbf16, #tpu.memory_space<vmem>>, %arg4: memref<32x16xbf16, #tpu.memory_space<vmem>>, %arg5: memref<64x128xf32, #tpu.memory_space<vmem>>) attributes {dimension_semantics = [], scalar_prefetch = 0 : i64, scratch_operands = 0 : i64, tpu.core_type = #tpu.core_type<tc>} {
    %c0 = arith.constant 0 : index
    %c0_0 = arith.constant 0 : index
    %0 = vector.load %arg1[%c0, %c0_0] : memref<64x64xbf16, #tpu.memory_space<vmem>>, vector<64x64xbf16>
    %c0_1 = arith.constant 0 : index
    %c0_2 = arith.constant 0 : index
    %1 = vector.load %arg0[%c0_1, %c0_2] : memref<64x16xbf16, #tpu.memory_space<vmem>>, vector<64x16xbf16>
    %c0_3 = arith.constant 0 : index
    %c0_4 = arith.constant 0 : index
    %2 = vector.load %arg2[%c0_3, %c0_4] : memref<32x32xbf16, #tpu.memory_space<vmem>>, vector<32x32xbf16>
    %cst = arith.constant dense<0.000000e+00> : vector<64x16xf32>
    %3 = tpu.matmul %0, %1, %cst {dimension_numbers = #tpu.dot_dimension_numbers<[1], [0], [0], [1], [0, 0, 1, 1], [], []>} : vector<64x64xbf16>, vector<64x16xbf16>, vector<64x16xf32> -> vector<64x16xf32>
    %4 = arith.truncf %3 : vector<64x16xf32> to vector<64x16xbf16>
    %5 = tpu.concatenate %1, %4 in 1 : vector<64x16xbf16>, vector<64x16xbf16> -> vector<64x32xbf16>
    %cst_5 = arith.constant dense<0.000000e+00> : vector<64x32xf32>
    %6 = tpu.matmul %5, %2, %cst_5 {dimension_numbers = #tpu.dot_dimension_numbers<[1], [0], [0], [1], [0, 0, 1, 1], [], []>} : vector<64x32xbf16>, vector<32x32xbf16>, vector<64x32xf32> -> vector<64x32xf32>
    %cst_6 = arith.constant 0.000000e+00 : f32
    %7 = vector.broadcast %cst_6 : f32 to vector<64x32xf32>
    %8 = arith.maximumf %6, %7 : vector<64x32xf32>
    %9 = arith.truncf %8 : vector<64x32xf32> to vector<64x32xbf16>
    %c0_7 = arith.constant 0 : index
    %c0_8 = arith.constant 0 : index
    %10 = vector.load %arg3[%c0_7, %c0_8] : memref<64x32xbf16, #tpu.memory_space<vmem>>, vector<64x32xbf16>
    %cst_9 = arith.constant dense<0.000000e+00> : vector<64x32xf32>
    %11 = tpu.matmul %0, %9, %cst_9 {dimension_numbers = #tpu.dot_dimension_numbers<[1], [0], [0], [1], [0, 0, 1, 1], [], []>} : vector<64x64xbf16>, vector<64x32xbf16>, vector<64x32xf32> -> vector<64x32xf32>
    %12 = arith.truncf %11 : vector<64x32xf32> to vector<64x32xbf16>
    %13 = tpu.concatenate %9, %12 in 1 : vector<64x32xbf16>, vector<64x32xbf16> -> vector<64x64xbf16>
    %cst_10 = arith.constant dense<0.000000e+00> : vector<64x32xf32>
    %14 = tpu.matmul %13, %10, %cst_10 {dimension_numbers = #tpu.dot_dimension_numbers<[1], [0], [0], [1], [0, 0, 1, 1], [], []>} : vector<64x64xbf16>, vector<64x32xbf16>, vector<64x32xf32> -> vector<64x32xf32>
    %cst_11 = arith.constant 0.000000e+00 : f32
    %15 = vector.broadcast %cst_11 : f32 to vector<64x32xf32>
    %16 = arith.maximumf %14, %15 : vector<64x32xf32>
    %17 = arith.truncf %16 : vector<64x32xf32> to vector<64x32xbf16>
    %c0_12 = arith.constant 0 : index
    %c0_13 = arith.constant 0 : index
    %18 = vector.load %arg4[%c0_12, %c0_13] : memref<32x16xbf16, #tpu.memory_space<vmem>>, vector<32x16xbf16>
    %cst_14 = arith.constant dense<0.000000e+00> : vector<64x16xf32>
    %19 = tpu.matmul %17, %18, %cst_14 {dimension_numbers = #tpu.dot_dimension_numbers<[1], [0], [0], [1], [0, 0, 1, 1], [], []>} : vector<64x32xbf16>, vector<32x16xbf16>, vector<64x16xf32> -> vector<64x16xf32>
    %20 = vector.extract_strided_slice %19 {offsets = [0, 8], sizes = [64, 8], strides = [1, 1]} : vector<64x16xf32> to vector<64x8xf32>
    %21 = arith.truncf %20 : vector<64x8xf32> to vector<64x8xbf16>
    %cst_15 = arith.constant dense<0.000000e+00> : vector<64x8xf32>
    %22 = tpu.matmul %0, %21, %cst_15 {dimension_numbers = #tpu.dot_dimension_numbers<[1], [0], [0], [1], [0, 0, 1, 1], [], []>} : vector<64x64xbf16>, vector<64x8xbf16>, vector<64x8xf32> -> vector<64x8xf32>
    %23 = vector.extract_strided_slice %19 {offsets = [0, 0], sizes = [64, 8], strides = [1, 1]} : vector<64x16xf32> to vector<64x8xf32>
    %24 = arith.addf %23, %22 : vector<64x8xf32>
    %cst_16 = arith.constant 0.000000e+00 : f32
    %25 = vector.broadcast %cst_16 : f32 to vector<64x120xf32>
    %26 = tpu.concatenate %24, %25 in 1 : vector<64x8xf32>, vector<64x120xf32> -> vector<64x128xf32>
    %c0_17 = arith.constant 0 : index
    %c0_18 = arith.constant 0 : index
    %27 = vector.load %arg5[%c0_17, %c0_18] : memref<64x128xf32, #tpu.memory_space<vmem>>, vector<64x128xf32>
    tpu.vector_store %arg5[%c0_17, %c0_18], %26 {strides = array<i32>} : memref<64x128xf32, #tpu.memory_space<vmem>>, vector<64x128xf32>,
    return
  }
}

</mosaic_0001>

<bundles_post_ra>
// kernel: gnn_module_forward.1
= control target key start
LH: loop header
LB: loop body
LE: loop exit
PB: predicated region body
PF: predicated region fallthrough
CT: control target
= control target key end

     0   :  { %vm85_vm0 = vcmask 523264   ;;  %vm179_vm1 = vcmask 130048   ;;  %vm204_vm2 = vcmask 261120   ;;  %s899_s21 = smov 32   ;;  %vm686_vm3 = vcmask 64512   ;;  %s1059_s0 = inlined_call_operand.vmem [shape: bf16[64,16], index: 0, kind: input, shape index: {}]   ;;  %s1060_s1 = inlined_call_operand.vmem [shape: bf16[64,64], index: 1, kind: input, shape index: {}]   ;;  %s1061_s2 = inlined_call_operand.vmem [shape: bf16[32,32], index: 2, kind: input, shape index: {}]   ;;  %s1062_s3 = inlined_call_operand.vmem [shape: bf16[64,32], index: 3, kind: input, shape index: {}]   ;;  %s1063_s4 = inlined_call_operand.vmem [shape: bf16[32,16], index: 4, kind: input, shape index: {}]   ;;  %s1064_s5 = inlined_call_operand.vmem [shape: f32[64,128], index: 5, kind: output, shape index: {}]  }
   0x1   :  { %v882_v0 = vld [vmem:[%s1059_s0] sm:$0xff]   ;;  %v883_v1 = vld [vmem:[%s1059_s0 + $0x8] sm:$0xff]   ;;  %v884_v2 = vld [vmem:[%s1059_s0 + $0x10] sm:$0xff]  }
   0x2   :  { %791 = vmatprep.subr.bf16.mxu0 %v882_v0  ;;  %v943_v3 = vld [vmem:[%s1060_s1] sm:$0xff]   ;;  %v885_v4 = vld [vmem:[%s1059_s0 + $0x18] sm:$0xff]   ;;  %v953_v5 = vld [vmem:[%s1060_s1 + $0x8] sm:$0xff]  }
   0x3   :  { %792 = vmatpush3.bf16.msra.mxu0 %v882_v0  ;;  %799 = vmatprep.mubr.msk.bf16.mxu0 %vm85_vm0, %v943_v3  ;;  %v958_v6 = vld [vmem:[%s1060_s1 + $0x10] sm:$0xff]   ;;  %v967_v7 = vld [vmem:[%s1060_s1 + $0x18] sm:$0xff]   ;;  %v890_v8 = vld [vmem:[%s1061_s2] sm:$0xff]   ;;  %s898_s1 = smov 16  }
   0x4   :  { %793 = vmatprep.subr.bf16.mxu0 %v883_v1  ;;  %807 = vmatprep.subr.bf16.mxu1 %v890_v8  ;;  %v891_v9 = vld [vmem:[%s1061_s2 + $0x8] sm:$0xff]   ;;  %v892_v50 = vld [vmem:[%s1062_s3] sm:$0xff]   ;;  %v894_v52 = vld [vmem:[%s1062_s3 + $0x10] sm:$0xff]  }
   0x5   :  { %808 = vmatpush3.bf16.msra.mxu1 %v890_v8  ;;  %v893_v51 = vld [vmem:[%s1062_s3 + $0x8] sm:$0xff]   ;;  %v895_v53 = vld [vmem:[%s1062_s3 + $0x18] sm:$0xff]   ;;  %v896_v60 = vld [vmem:[%s1063_s4] sm:$0xff]  }
   0x6   :  { %809 = vmatprep.subr.bf16.mxu1 %v891_v9 }
   0x7   :  { %794 = vmatpush3.bf16.msra.mxu0 %v883_v1 }
   0x8   :  { %795 = vmatprep.subr.bf16.mxu0 %v884_v2 }
   0x9   :  { %810 = vmatpush3.bf16.msra.mxu1 %v891_v9 }
   0xb   :  { %796 = vmatpush3.bf16.msra.mxu0 %v884_v2 }
   0xc   :  { %797 = vmatprep.subr.bf16.mxu0 %v885_v4 }
   0xf   :  { %798 = vmatpush3.bf16.msra.mxu0 %v885_v4 }
  0x10   :  { %835 = vmatprep.subr.bf16.mxu0 %v892_v50 }
  0x12   :  { %800 = vmatmul.mubr.msk.bf16.vlgmr.msra.gmra.mrb[0].mxu0 %vm85_vm0, %v953_v5 }
  0x13   :  { %803 = vmatprep.mubr.msk.bf16.mxu0 %vm85_vm0, %v958_v6  ;;  %836 = vmatpush3.bf16.msra.mxu0 %v892_v50 }
  0x14   :  { %837 = vmatprep.subr.bf16.mxu0 %v893_v51 }
  0x17   :  { %838 = vmatpush3.bf16.msra.mxu0 %v893_v51 }
  0x18   :  { %839 = vmatprep.subr.bf16.mxu0 %v894_v52 }
  0x1a   :  { %804 = vmatmul.mubr.msk.bf16.gmra.mrb[4].mxu0 %vm85_vm0, %v967_v7 }
  0x1b   :  { %840 = vmatpush3.bf16.msra.mxu0 %v894_v52 }
  0x1c   :  { %841 = vmatprep.subr.bf16.mxu0 %v895_v53 }
  0x1f   :  { %842 = vmatpush3.bf16.msra.mxu0 %v895_v53 }
  0xe5   :  { %v801_v10 = vpop.f32.mrb[0].mxu0 }
  0xe6   :  { %v132_v11 = vpop.f32.mrb[1].mxu0 }
  0xe7   :  { %v802_v12 = vpop.f32.mrb[2].mxu0 }
  0xe8   :  { %v164_v13 = vpack.c.bf16 %v802_v12, %v801_v10  ;;  %v135_v14 = vpop.f32.mrb[3].mxu0 }
  0xe9   :  { %v163_v15 = vpack.c.bf16 %v135_v14, %v132_v11 }
  0xeb   :  { %171 = vrot.lane.b32.xlu0 %v163_v15, %s898_s1  ;;  %v897_v15 = vld [vmem:[%s1063_s4 + $0x8] sm:$0xff]   ;;  %s900_s4 = smov 120  }
  0xed   :  { %v805_v16 = vpop.f32.mrb[4].mxu0 }
  0xee   :  { %v148_v17 = vpop.f32.mrb[5].mxu0 }
  0xef   :  { %173 = vrot.lane.b32.xlu0 %v164_v13, %s898_s1  ;;  %v806_v18 = vpop.f32.mrb[6].mxu0 }
  0xf0   :  { %v166_v19 = vpack.c.bf16 %v806_v18, %v805_v16  ;;  %v151_v20 = vpop.f32.mrb[7].mxu0 }
  0xf1   :  { %v165_v21 = vpack.c.bf16 %v151_v20, %v148_v17 }
  0xf3   :  { %175 = vrot.lane.b32.xlu1 %v165_v21, %s898_s1 }
  0xf7   :  { %177 = vrot.lane.b32.xlu1 %v166_v19, %s898_s1 }
 0x15d   :  { %v172_v22 = vpop.permute.xlu0 %171 }
 0x15e   :  { %v182_v23 = vsel %vm179_vm1, %v882_v0, %v172_v22 }
 0x15f   :  { %811 = vmatprep.mubr.msk.bf16.mxu1 %vm204_vm2, %v182_v23 }
 0x161   :  { %v174_v24 = vpop.permute.xlu0 %173 }
 0x162   :  { %v185_v25 = vsel %vm179_vm1, %v883_v1, %v174_v24 }
 0x163   :  { %812 = vmatmul.mubr.msk.bf16.vlgmr.msra.gmra.mrb[0].mxu1 %vm204_vm2, %v185_v25 }
 0x165   :  { %v176_v26 = vpop.permute.xlu1 %175 }
 0x166   :  { %v188_v27 = vsel %vm179_vm1, %v884_v2, %v176_v26 }
 0x167   :  { %815 = vmatprep.mubr.msk.bf16.mxu1 %vm204_vm2, %v188_v27 }
 0x169   :  { %v178_v28 = vpop.permute.xlu1 %177 }
 0x16a   :  { %v191_v29 = vsel %vm179_vm1, %v885_v4, %v178_v28 }
 0x16b   :  { %816 = vmatmul.mubr.msk.bf16.gmra.mrb[4].mxu1 %vm204_vm2, %v191_v29 }
 0x16c   :  { %827 = vmatprep.mubr.msk.bf16.mxu1 %vm85_vm0, %v943_v3 }
 0x236   :  { %v813_v30 = vpop.f32.mrb[0].mxu1 }
 0x237   :  { %v247_v31 = vpop.f32.mrb[1].mxu1  ;;  %v280_v33 = vmax.f32 %v813_v30, 0.0 }
 0x238   :  { %v814_v32 = vpop.f32.mrb[2].mxu1  ;;  %v278_v36 = vmax.f32 %v247_v31, 0.0 }
 0x239   :  { %v281_v34 = vmax.f32 %v814_v32, 0.0  ;;  %v250_v35 = vpop.f32.mrb[3].mxu1 }
 0x23a   :  { %v279_v37 = vmax.f32 %v250_v35, 0.0 }
 0x23b   :  { %v287_v38 = vpack.c.bf16 %v281_v34, %v280_v33 }
 0x23c   :  { %v286_v39 = vpack.c.bf16 %v279_v37, %v278_v36 }
 0x23e   :  { %v817_v40 = vpop.f32.mrb[4].mxu1  ;;  %819 = vmatprep.subr.bf16.mxu1 %v286_v39 }
 0x23f   :  { %v263_v41 = vpop.f32.mrb[5].mxu1  ;;  %820 = vmatpush3.bf16.msra.mxu1 %v286_v39  ;;  %v284_v43 = vmax.f32 %v817_v40, 0.0 }
 0x240   :  { %v818_v42 = vpop.f32.mrb[6].mxu1  ;;  %821 = vmatprep.subr.bf16.mxu1 %v287_v38  ;;  %v282_v46 = vmax.f32 %v263_v41, 0.0 }
 0x241   :  { %v285_v44 = vmax.f32 %v818_v42, 0.0  ;;  %v266_v45 = vpop.f32.mrb[7].mxu1 }
 0x242   :  { %v283_v47 = vmax.f32 %v266_v45, 0.0 }
 0x243   :  { %v289_v48 = vpack.c.bf16 %v285_v44, %v284_v43  ;;  %822 = vmatpush3.bf16.msra.mxu1 %v287_v38 }
 0x244   :  { %v288_v49 = vpack.c.bf16 %v283_v47, %v282_v46 }
 0x246   :  { %823 = vmatprep.subr.bf16.mxu1 %v288_v49 }
 0x247   :  { %824 = vmatpush3.bf16.msra.mxu1 %v288_v49 }
 0x248   :  { %825 = vmatprep.subr.bf16.mxu1 %v289_v48 }
 0x24b   :  { %826 = vmatpush3.bf16.msra.mxu1 %v289_v48 }
 0x24c   :  { %851 = vmatprep.subr.bf16.mxu1 %v896_v60 }
 0x24e   :  { %828 = vmatmul.mubr.msk.bf16.vlgmr.msra.gmra.mrb[8].mxu1 %vm85_vm0, %v953_v5 }
 0x24f   :  { %831 = vmatprep.mubr.msk.bf16.mxu1 %vm85_vm0, %v958_v6  ;;  %852 = vmatpush3.bf16.msra.mxu1 %v896_v60 }
 0x250   :  { %853 = vmatprep.subr.bf16.mxu1 %v897_v15 }
 0x253   :  { %854 = vmatpush3.bf16.msra.mxu1 %v897_v15 }
 0x256   :  { %832 = vmatmul.mubr.msk.bf16.gmra.mrb[12].mxu1 %vm85_vm0, %v967_v7 }
 0x321   :  { %v829_v54 = vpop.f32.mrb[8].mxu1 }
 0x322   :  { %v332_v55 = vpop.f32.mrb[9].mxu1 }
 0x323   :  { %v830_v56 = vpop.f32.mrb[10].mxu1 }
 0x324   :  { %v364_v57 = vpack.c.bf16 %v830_v56, %v829_v54  ;;  %v335_v58 = vpop.f32.mrb[11].mxu1 }
 0x325   :  { %v363_v59 = vpack.c.bf16 %v335_v58, %v332_v55 }
 0x326   :  { %373 = vrot.lane.b32.xlu1 %v364_v57, %s899_s21 }
 0x327   :  { %371 = vrot.lane.b32.xlu0 %v363_v59, %s899_s21 }
 0x329   :  { %v833_v61 = vpop.f32.mrb[12].mxu1 }
 0x32a   :  { %v348_v62 = vpop.f32.mrb[13].mxu1 }
 0x32b   :  { %v834_v63 = vpop.f32.mrb[14].mxu1 }
 0x32c   :  { %v366_v0 = vpack.c.bf16 %v834_v63, %v833_v61  ;;  %v351_v1 = vpop.f32.mrb[15].mxu1 }
 0x32d   :  { %v365_v2 = vpack.c.bf16 %v351_v1, %v348_v62 }
 0x32e   :  { %377 = vrot.lane.b32.xlu1 %v366_v0, %s899_s21 }
 0x32f   :  { %375 = vrot.lane.b32.xlu0 %v365_v2, %s899_s21 }
 0x398   :  { %v374_v4 = vpop.permute.xlu1 %373 }
 0x399   :  { %v372_v8 = vpop.permute.xlu0 %371  ;;  %v384_v10 = vsel %vm204_vm2, %v287_v38, %v374_v4 }
 0x39a   :  { %v381_v9 = vsel %vm204_vm2, %v286_v39, %v372_v8 }
 0x39b   :  { %843 = vmatprep.mubr.msk.bf16.mxu0 %vm85_vm0, %v381_v9 }
 0x39c   :  { %844 = vmatmul.mubr.msk.bf16.vlgmr.msra.gmra.mrb[8].mxu0 %vm85_vm0, %v384_v10 }
 0x3a0   :  { %v378_v11 = vpop.permute.xlu1 %377 }
 0x3a1   :  { %v376_v12 = vpop.permute.xlu0 %375  ;;  %v390_v14 = vsel %vm204_vm2, %v289_v48, %v378_v11 }
 0x3a2   :  { %v387_v13 = vsel %vm204_vm2, %v288_v49, %v376_v12 }
 0x3a3   :  { %847 = vmatprep.mubr.msk.bf16.mxu0 %vm85_vm0, %v387_v13 }
 0x3a4   :  { %848 = vmatmul.mubr.msk.bf16.gmra.mrb[12].mxu0 %vm85_vm0, %v390_v14 }
 0x3a5   :  { %871 = vmatprep.mubr.msk.bf16.mxu0 %vm85_vm0, %v943_v3 }
 0x46f   :  { %v845_v16 = vpop.f32.mrb[8].mxu0 }
 0x470   :  { %v457_v17 = vpop.f32.mrb[9].mxu0  ;;  %v490_v19 = vmax.f32 %v845_v16, 0.0 }
 0x471   :  { %v846_v18 = vpop.f32.mrb[10].mxu0  ;;  %v488_v22 = vmax.f32 %v457_v17, 0.0 }
 0x472   :  { %v491_v20 = vmax.f32 %v846_v18, 0.0  ;;  %v460_v21 = vpop.f32.mrb[11].mxu0 }
 0x473   :  { %v489_v23 = vmax.f32 %v460_v21, 0.0 }
 0x474   :  { %v497_v24 = vpack.c.bf16 %v491_v20, %v490_v19 }
 0x475   :  { %v496_v25 = vpack.c.bf16 %v489_v23, %v488_v22 }
 0x477   :  { %v849_v26 = vpop.f32.mrb[12].mxu0  ;;  %855 = vmatprep.mubr.msk.bf16.mxu1 %vm204_vm2, %v496_v25 }
 0x478   :  { %v473_v3 = vpop.f32.mrb[13].mxu0  ;;  %856 = vmatmul.mubr.msk.bf16.vlgmr.msra.gmra.mrb[16].mxu1 %vm204_vm2, %v497_v24  ;;  %v494_v28 = vmax.f32 %v849_v26, 0.0 }
 0x479   :  { %v850_v27 = vpop.f32.mrb[14].mxu0  ;;  %v492_v31 = vmax.f32 %v473_v3, 0.0 }
 0x47a   :  { %v495_v29 = vmax.f32 %v850_v27, 0.0  ;;  %v476_v30 = vpop.f32.mrb[15].mxu0 }
 0x47b   :  { %v493_v32 = vmax.f32 %v476_v30, 0.0 }
 0x47c   :  { %v499_v33 = vpack.c.bf16 %v495_v29, %v494_v28 }
 0x47d   :  { %v498_v34 = vpack.c.bf16 %v493_v32, %v492_v31 }
 0x47f   :  { %859 = vmatprep.mubr.msk.bf16.mxu1 %vm204_vm2, %v498_v34 }
 0x480   :  { %860 = vmatmul.mubr.msk.bf16.gmra.mrb[20].mxu1 %vm204_vm2, %v499_v33 }
 0x54b   :  { %v857_v35 = vpop.f32.mrb[16].mxu1 }
 0x54c   :  { %v562_v36 = vpop.f32.mrb[17].mxu1 }
 0x54d   :  { %v858_v37 = vpop.f32.mrb[18].mxu1 }
 0x54e   :  { %v594_v38 = vpack.c.bf16 %v858_v37, %v857_v35  ;;  %v565_v39 = vpop.f32.mrb[19].mxu1 }
 0x54f   :  { %v593_v40 = vpack.c.bf16 %v565_v39, %v562_v36 }
 0x550   :  { %603 = vrot.lane.b32.xlu1 %v594_v38, %s900_s4 }
 0x551   :  { %601 = vrot.lane.b32.xlu0 %v593_v40, %s900_s4 }
 0x553   :  { %v861_v41 = vpop.f32.mrb[20].mxu1 }
 0x554   :  { %v578_v42 = vpop.f32.mrb[21].mxu1 }
 0x555   :  { %v862_v43 = vpop.f32.mrb[22].mxu1 }
 0x556   :  { %v596_v44 = vpack.c.bf16 %v862_v43, %v861_v41  ;;  %v581_v45 = vpop.f32.mrb[23].mxu1 }
 0x557   :  { %v595_v46 = vpack.c.bf16 %v581_v45, %v578_v42 }
 0x558   :  { %607 = vrot.lane.b32.xlu1 %v596_v44, %s900_s4 }
 0x559   :  { %605 = vrot.lane.b32.xlu0 %v595_v46, %s900_s4 }
 0x5c2   :  { %v604_v48 = vpop.permute.xlu1 %603 }
 0x5c3   :  { %v602_v47 = vpop.permute.xlu0 %601 }
 0x5c4   :  { %863 = vmatprep.subr.bf16.mxu0 %v602_v47 }
 0x5c5   :  { %864 = vmatpush3.bf16.msra.mxu0 %v602_v47 }
 0x5c6   :  { %865 = vmatprep.subr.bf16.mxu0 %v604_v48 }
 0x5c9   :  { %866 = vmatpush3.bf16.msra.mxu0 %v604_v48 }
 0x5ca   :  { %v608_v50 = vpop.permute.xlu1 %607 }
 0x5cb   :  { %v606_v49 = vpop.permute.xlu0 %605 }
 0x5cc   :  { %867 = vmatprep.subr.bf16.mxu0 %v606_v49 }
 0x5cd   :  { %868 = vmatpush3.bf16.msra.mxu0 %v606_v49 }
 0x5ce   :  { %869 = vmatprep.subr.bf16.mxu0 %v608_v50 }
 0x5d1   :  { %870 = vmatpush3.bf16.msra.mxu0 %v608_v50 }
 0x5d4   :  { %872 = vmatmul.mubr.msk.bf16.vlgmr.msra.gmra.mrb[16].mxu0 %vm85_vm0, %v953_v5 }
 0x5d5   :  { %875 = vmatprep.mubr.msk.bf16.mxu0 %vm85_vm0, %v958_v6 }
 0x5dc   :  { %876 = vmatmul.mubr.msk.bf16.gmra.mrb[20].mxu0 %vm85_vm0, %v967_v7 }
 0x6a7   :  { %v873_v51 = vpop.f32.mrb[16].mxu0 }
 0x6a8   :  { %v680_v52 = vadd.f32 %v873_v51, %v857_v35  ;;  %v647_v53 = vpop.f32.mrb[17].mxu0 }
 0x6a9   :  { %v678_v54 = vadd.f32 %v647_v53, %v562_v36  ;;  %v874_v55 = vpop.f32.mrb[18].mxu0 }
 0x6aa   :  { %v689_v56 = vsel %vm686_vm3, %v680_v52, 0.0  ;;  %v681_v57 = vadd.f32 %v874_v55, %v858_v37  ;;  %v650_v58 = vpop.f32.mrb[19].mxu0 }
 0x6ab   :  { %697 = vst [vmem:[%s1064_s5 + $0x10] sm:$0xff] %v689_v56  ;;  %v687_v5 = vsel %vm686_vm3, %v678_v54, 0.0  ;;  %v679_v6 = vadd.f32 %v650_v58, %v565_v39 }
 0x6ac   :  { %695 = vst [vmem:[%s1064_s5] sm:$0xff] %v687_v5  ;;  %v690_v7 = vsel %vm686_vm3, %v681_v57, 0.0 }
 0x6ad   :  { %698 = vst [vmem:[%s1064_s5 + $0x18] sm:$0xff] %v690_v7  ;;  %v688_v59 = vsel %vm686_vm3, %v679_v6, 0.0 }
 0x6ae   :  { %696 = vst [vmem:[%s1064_s5 + $0x8] sm:$0xff] %v688_v59 }
 0x6af   :  { %v877_v60 = vpop.f32.mrb[20].mxu0 }
 0x6b0   :  { %v684_v61 = vadd.f32 %v877_v60, %v861_v41  ;;  %v663_v62 = vpop.f32.mrb[21].mxu0 }
 0x6b1   :  { %v682_v63 = vadd.f32 %v663_v62, %v578_v42  ;;  %v878_v0 = vpop.f32.mrb[22].mxu0 }
 0x6b2   :  { %v693_v1 = vsel %vm686_vm3, %v684_v61, 0.0  ;;  %v685_v2 = vadd.f32 %v878_v0, %v862_v43  ;;  %v666_v4 = vpop.f32.mrb[23].mxu0 }
 0x6b3   :  { %701 = vst [vmem:[%s1064_s5 + $0x30] sm:$0xff] %v693_v1  ;;  %v691_v8 = vsel %vm686_vm3, %v682_v63, 0.0  ;;  %v683_v9 = vadd.f32 %v666_v4, %v581_v45 }
 0x6b4   :  { %699 = vst [vmem:[%s1064_s5 + $0x20] sm:$0xff] %v691_v8  ;;  %v694_v10 = vsel %vm686_vm3, %v685_v2, 0.0 }
 0x6b5   :  { %702 = vst [vmem:[%s1064_s5 + $0x38] sm:$0xff] %v694_v10  ;;  %v692_v11 = vsel %vm686_vm3, %v683_v9, 0.0 }
 0x6b6   :  { %700 = vst [vmem:[%s1064_s5 + $0x28] sm:$0xff] %v692_v11 }

</bundles_post_ra>
